<compile_context>
chip_gen: v7x
topology: tpu7x:2x2x1
jax: 0.10.0
libtpu: 0.0.40
codegen_flags: <defaults>
</compile_context>

<pallas_src>
import math

import jax
import jax.numpy as jnp
from jax.experimental import pallas as pl
from jax.experimental.pallas import tpu as pltpu


def _round_up(x, m):
    return ((x + m - 1) // m) * m


def _sinusoidal_kernel_lane_packed(time_ref, freqs_ref, out_ref):
    # time_ref:  (1, TBL) f32         timesteps along the lane axis
    # freqs_ref: (half_dim, 1) f32    frequency column along sublanes
    # out_ref:   (dim, TBL)           [sin ; cos] stacked on sublanes
    arg = freqs_ref[...] * time_ref[...]          # (half_dim, TBL), lane-dense
    half = arg.shape[0]
    if half % 8 == 0:
        # Two aligned sublane-slice stores; no concatenated temp.
        out_ref[:half, :] = jnp.sin(arg).astype(out_ref.dtype)
        out_ref[half:, :] = jnp.cos(arg).astype(out_ref.dtype)
    else:
        emb = jnp.concatenate([jnp.sin(arg), jnp.cos(arg)], axis=0)
        out_ref[...] = emb.astype(out_ref.dtype)


def _sinusoidal_kernel_row_major(time_ref, freqs_ref, out_ref):
    # time_ref:  (TB, 1) f32          batch rows on sublanes
    # freqs_ref: (1, half_dim) f32    hoisted frequency table (VMEM resident)
    # out_ref:   (TB, dim)            [sin | cos] along lanes
    arg = time_ref[...] * freqs_ref[...]          # (TB, half_dim)
    half = arg.shape[1]
    if half % 128 == 0:
        # Both halves are lane-aligned: two unmasked slice stores, no concat temp.
        out_ref[:, :half] = jnp.sin(arg).astype(out_ref.dtype)
        out_ref[:, half:] = jnp.cos(arg).astype(out_ref.dtype)
    else:
        emb = jnp.concatenate([jnp.sin(arg), jnp.cos(arg)], axis=-1)
        out_ref[...] = emb.astype(out_ref.dtype)


def sinusoidal_position_embeddings(time, dim, *, block_rows=1024,
                                   block_lanes=2048, out_dtype=jnp.float32):
    """time: (B,) float -> (B, dim) sinusoidal embeddings (PyTorch-compatible)."""
    assert dim % 2 == 0, "dim must be even"
    assert dim >= 4, "dim must be >= 4 (half_dim - 1 divides the log scale)"
    half_dim = dim // 2
    log_scale = math.log(10000.0) / (half_dim - 1)

    b = time.shape[0]
    time_f32 = time.astype(jnp.float32)

    # Hoisted frequency table: computed once in plain JAX, resident in VMEM.
    freqs = jnp.exp(
        jnp.arange(half_dim, dtype=jnp.float32) * jnp.float32(-log_scale)
    )

    itemsize = jnp.dtype(out_dtype).itemsize
    cost = pl.CostEstimate(
        flops=b * half_dim,
        transcendentals=b * dim,
        bytes_accessed=b * dim * itemsize + b * 4 + half_dim * 4,
    )
    cparams = pltpu.CompilerParams(dimension_semantics=("parallel",))

    if half_dim < 128:
        # ---- Lane-packed (transposed) path: batch on lanes, dim on sublanes.
        if b <= 128:
            tbl = b                                        # single full-width tile
        else:
            # At least 2 grid steps (v7x megacore), lane tiles multiple of 128.
            tbl = min(block_lanes, _round_up(pl.cdiv(b, 2), 128))
        grid = (pl.cdiv(b, tbl),)

        out_t = pl.pallas_call(
            _sinusoidal_kernel_lane_packed,
            out_shape=jax.ShapeDtypeStruct((dim, b), out_dtype),
            grid_spec=pltpu.PrefetchScalarGridSpec(
                num_scalar_prefetch=0,
                grid=grid,
                in_specs=[
                    pl.BlockSpec((1, tbl), lambda i: (0, i)),        # timesteps
                    pl.BlockSpec((half_dim, 1), lambda i: (0, 0)),   # freqs
                ],
                out_specs=pl.BlockSpec((dim, tbl), lambda i: (0, i)),
            ),
            compiler_params=cparams,
            cost_estimate=cost,
        )(time_f32.reshape(1, b), freqs.reshape(half_dim, 1))

        # Module contract is (B, dim); consumers that accept (dim, B) should
        # take `out_t` directly and skip this transpose.
        return out_t.T

    # ---- Row-major path (dim >= 128): both halves already lane-dense.
    tb = min(block_rows, _round_up(b, 8))
    if b >= 16:
        # At least 2 grid steps so the parallel axis shards across v7x cores.
        tb = min(tb, _round_up(pl.cdiv(b, 2), 8))
    # Cap the output tile at ~4 MiB so double-buffered tiles stay well within
    # every generation's scoped-VMEM default (incl. v5e's 16 MiB).
    max_rows_by_vmem = max(8, ((4 * 1024 * 1024) // (dim * itemsize)) // 8 * 8)
    tb = min(tb, max_rows_by_vmem)
    grid = (pl.cdiv(b, tb),)

    out = pl.pallas_call(
        _sinusoidal_kernel_row_major,
        out_shape=jax.ShapeDtypeStruct((b, dim), out_dtype),
        grid_spec=pltpu.PrefetchScalarGridSpec(
            num_scalar_prefetch=0,
            grid=grid,
            in_specs=[
                pl.BlockSpec((tb, 1), lambda i: (i, 0)),             # timesteps
                pl.BlockSpec((1, half_dim), lambda i: (0, 0)),       # freqs
            ],
            out_specs=pl.BlockSpec((tb, dim), lambda i: (i, 0)),
        ),
        compiler_params=cparams,
        cost_estimate=cost,
    )(time_f32.reshape(b, 1), freqs.reshape(1, half_dim))
    return out


def _reference(time, dim):
    half_dim = dim // 2
    scale = math.log(10000.0) / (half_dim - 1)
    freqs = jnp.exp(jnp.arange(half_dim, dtype=jnp.float32) * -scale)
    emb = time.astype(jnp.float32)[:, None] * freqs[None, :]
    return jnp.concatenate([jnp.sin(emb), jnp.cos(emb)], axis=-1)


if __name__ == "__main__":
    key = jax.random.PRNGKey(0)

    # 1) Demo-like shape (diffusion timesteps): lane-packed path, dim < 128.
    batch, dim = 8, 32
    time = jax.random.uniform(key, (batch,), dtype=jnp.float32) * 1000.0
    out = jax.block_until_ready(sinusoidal_position_embeddings(time, dim))
    ref = _reference(time, dim)
    assert out.shape == (batch, dim)
    assert jnp.allclose(out, ref, atol=1e-5, rtol=1e-5), "mismatch (lane-packed)"

    # 2) Batch not a multiple of 8 / 128 — no padding, ragged tiles.
    time_odd = jax.random.uniform(jax.random.PRNGKey(1), (13,), jnp.float32) * 500.0
    out_odd = jax.block_until_ready(sinusoidal_position_embeddings(time_odd, dim))
    assert jnp.allclose(out_odd, _reference(time_odd, dim), atol=1e-5, rtol=1e-5), \
        "mismatch (ragged batch)"

    # 3) Row-major path (dim >= 128), multi-step grid + ragged last row tile.
    time_big = jax.random.uniform(jax.random.PRNGKey(2), (13,), jnp.float32) * 100.0
    out_big = jax.block_until_ready(sinusoidal_position_embeddings(time_big, 256))
    assert out_big.shape == (13, 256)
    assert jnp.allclose(out_big, _reference(time_big, 256), atol=1e-5, rtol=1e-5), \
        "mismatch (row-major)"

    print("KERNEL_OK")
</pallas_src>

<mosaic_0001>
module attributes {stable_mosaic.version = 11 : i64} {
  func.func @_sinusoidal_kernel_lane_packed(%arg0: i32, %arg1: memref<1x8xf32, #tpu.memory_space<vmem>>, %arg2: memref<16x1xf32, #tpu.memory_space<vmem>>, %arg3: memref<32x8xf32, #tpu.memory_space<vmem>>) attributes {dimension_semantics = [#tpu.dimension_semantics<parallel>], iteration_bounds = array<i64: 1>, scalar_prefetch = 0 : i64, scratch_operands = 0 : i64, tpu.core_type = #tpu.core_type<tc>, window_params = [{transform_indices = @transform_0, window_bounds = array<i64: 1, 8>}, {pipeline_mode = #tpu.pipeline_mode<synchronous>, transform_indices = @transform_1, window_bounds = array<i64: 16, 1>}, {transform_indices = @transform_2, window_bounds = array<i64: 32, 8>}]} {
    %c0 = arith.constant 0 : index
    %c0_0 = arith.constant 0 : index
    %0 = vector.load %arg2[%c0, %c0_0] : memref<16x1xf32, #tpu.memory_space<vmem>>, vector<16x1xf32>
    %c0_1 = arith.constant 0 : index
    %c0_2 = arith.constant 0 : index
    %1 = vector.load %arg1[%c0_1, %c0_2] : memref<1x8xf32, #tpu.memory_space<vmem>>, vector<1x8xf32>
    %2 = vector.broadcast %0 : vector<16x1xf32> to vector<16x8xf32>
    %3 = vector.broadcast %1 : vector<1x8xf32> to vector<16x8xf32>
    %4 = arith.mulf %2, %3 : vector<16x8xf32>
    %5 = math.sin %4 : vector<16x8xf32>
    %c0_3 = arith.constant 0 : index
    %c0_4 = arith.constant 0 : index
    %6 = vector.load %arg3[%c0_3, %c0_4] : memref<32x8xf32, #tpu.memory_space<vmem>>, vector<16x8xf32>
    tpu.vector_store %arg3[%c0_3, %c0_4], %5 {strides = array<i32>} : memref<32x8xf32, #tpu.memory_space<vmem>>, vector<16x8xf32>,
    %7 = math.cos %4 : vector<16x8xf32>
    %c16 = arith.constant 16 : index
    %c0_5 = arith.constant 0 : index
    %8 = vector.load %arg3[%c16, %c0_5] : memref<32x8xf32, #tpu.memory_space<vmem>>, vector<16x8xf32>
    tpu.vector_store %arg3[%c16, %c0_5], %7 {strides = array<i32>} : memref<32x8xf32, #tpu.memory_space<vmem>>, vector<16x8xf32>,
    return
  }
  func.func @transform_0(%arg0: i32) -> (i32, i32) {
    %c0_i32 = arith.constant 0 : i32
    %c0_i32_0 = arith.constant 0 : i32
    return %c0_i32, %arg0 : i32, i32
  }
  func.func @transform_1(%arg0: i32) -> (i32, i32) {
    %c0_i32 = arith.constant 0 : i32
    %c0_i32_0 = arith.constant 0 : i32
    %c0_i32_1 = arith.constant 0 : i32
    return %c0_i32, %c0_i32_0 : i32, i32
  }
  func.func @transform_2(%arg0: i32) -> (i32, i32) {
    %c0_i32 = arith.constant 0 : i32
    %c0_i32_0 = arith.constant 0 : i32
    return %c0_i32, %arg0 : i32, i32
  }
}

</mosaic_0001>

<bundles_post_ra>
// kernel: tpu_custom_call.1
= control target key start
LH: loop header
LB: loop body
LE: loop exit
PB: predicated region body
PF: predicated region fallthrough
CT: control target
= control target key end

     0   :  { %v496_v0 = vmov 0   ;;  %v497_v24 = vmov 683565275   ;;  %v498_v28 = vmov 2475754826   ;;  %s603_s1 = inlined_call_operand.vmem [shape: f32[16,1], index: 1, kind: input, shape index: {}]   ;;  %s604_s0 = inlined_call_operand.vmem [shape: f32[1,8], index: 0, kind: input, shape index: {}]   ;;  %s605_s2 = inlined_call_operand.vmem [shape: f32[32,8], index: 2, kind: output, shape index: {}]  }
   0x1   :  { %487 = vset.pattern.permute.xlu0 %v496_v0  ;;  %v11_v1 = vld [vmem:[%s603_s1] sm:$0xff]  ;;  %v12_v2 = vld [vmem:[%s603_s1 + $0x8] sm:$0xff]  ;;  %v499_v30 = vmov 2131351028   ;;  %v500_v32 = vmov 2102212464  }
   0x2   :  { %16 = vperm.xlu0 %487, %v11_v1   ;;  %v455_v3 = vld [vmem:[%s604_s0] ss:$0 sm:$0xff]  ;;  %v501_v34 = vmov 920167782   ;;  %v502_v41 = vmov 1326507024  }
   0x6   :  { %21 = vperm.xlu0 %487, %v12_v2  }
  0x81   :  { %v17_v4 = vpop.permute.xlu0 %16 }
  0x82   :  { %v527_v5 = vmul.f32 %v455_v3, %v17_v4 }
  0x84   :  { %v32_v6 = vand.u32 2147483647, %v527_v5  ;;  %v35_v7 = vand.u32 2139095040, %v527_v5  ;;  %vm34_vm14 = vcmp.lt.s32.totalorder %v527_v5, 0 }
  0x85   :  { %v22_v8 = vpop.permute.xlu0 %21 }
  0x86   :  { %v36_v9 = vshrl.u32 %v35_v7, 23  ;;  %v531_v10 = vmul.f32 %v455_v3, %v22_v8  ;;  %v39_v11 = vand.u32 8388607, %v32_v6  ;;  %vm33_vm15 = vcmp.le.f32.partialorder %v32_v6, 0.7853982 }
  0x88   :  { %v456_v12 = vadd.s32 4294967169, %v36_v9  ;;  %v139_v13 = vand.u32 2139095040, %v531_v10  ;;  %v40_v15 = vor.u32 8388608, %v39_v11  ;;  %v136_v17 = vand.u32 2147483647, %v531_v10 }
  0x8a   :  { %v42_v14 = vadd.s32 1, %v456_v12  ;;  %v140_v16 = vshrl.u32 %v139_v13, 23  ;;  %v537_v22 = vshll.u32 %v40_v15, 8  ;;  %v143_v26 = vand.u32 8388607, %v136_v17 }
  0x8c   :  { %vm43_vm0 = vcmp.gt.s32.totalorder %v42_v14, 0  ;;  %v460_v19 = vadd.s32 4294967169, %v140_v16  ;;  %v144_v56 = vor.u32 8388608, %v143_v26 }
  0x8d   :  { %v44_v18 = vsel %vm43_vm0, %v42_v14, 0  ;;  %vm138_vm0 = vcmp.lt.s32.totalorder %v531_v10, 0 }
  0x8e   :  { %v45_v20 = vshrl.u32 %v44_v18, 5  ;;  %v46_v21 = vand.u32 31, %v44_v18  ;;  %v146_v27 = vadd.s32 1, %v460_v19  ;;  %v184_v7 = vshll.u32 %v144_v56, 8 }
  0x90   :  { %v47_v23 = vsub.s32 32, %v46_v21  ;;  %v49_v25 = vshll.u32 %v497_v24, %v46_v21  ;;  %v52_v29 = vshll.u32 %v498_v28, %v46_v21  ;;  %v55_v31 = vshll.u32 %v499_v30, %v46_v21 }
  0x91   :  { %v58_v33 = vshll.u32 %v500_v32, %v46_v21  ;;  %v61_v35 = vshll.u32 %v501_v34, %v46_v21  ;;  %vm64_vm1 = vcmp.lt.s32.totalorder %v45_v20, 1  ;;  %vm66_vm2 = vcmp.lt.s32.totalorder %v45_v20, 3 }
  0x92   :  { %v50_v36 = vshrl.u32 %v498_v28, %v47_v23  ;;  %v53_v37 = vshrl.u32 %v499_v30, %v47_v23  ;;  %v56_v38 = vshrl.u32 %v500_v32, %v47_v23  ;;  %v48_v39 = vshrl.u32 %v497_v24, %v47_v23 }
  0x93   :  { %v59_v40 = vshrl.u32 %v501_v34, %v47_v23  ;;  %v62_v42 = vshrl.u32 %v502_v41, %v47_v23  ;;  %vm147_vm3 = vcmp.gt.s32.totalorder %v146_v27, 0  ;;  %vm67_vm4 = vcmp.lt.s32.totalorder %v45_v20, 4 }
  0x94   :  { %v51_v43 = vor.u32 %v50_v36, %v49_v25  ;;  %v54_v44 = vor.u32 %v53_v37, %v52_v29  ;;  %v57_v45 = vor.u32 %v56_v38, %v55_v31  ;;  %v148_v48 = vsel %vm147_vm3, %v146_v27, 0 }
  0x95   :  { %v60_v46 = vor.u32 %v59_v40, %v58_v33  ;;  %v63_v47 = vor.u32 %v62_v42, %v61_v35  ;;  %vm65_vm5 = vcmp.lt.s32.totalorder %v45_v20, 2  ;;  %v150_v59 = vand.u32 31, %v148_v48 }
  0x96   :  { %v68_v49 = vsel %vm64_vm1, %v48_v39, %v51_v43  ;;  %v69_v50 = vsel %vm67_vm4, %v57_v45, 2102212464  ;;  %v72_v51 = vsel %vm64_vm1, %v51_v43, %v54_v44  ;;  %v76_v52 = vsel %vm64_vm1, %v54_v44, %v57_v45 }
  0x97   :  { %v70_v53 = vsel %vm66_vm2, %v54_v44, %v69_v50  ;;  %v73_v54 = vsel %vm67_vm4, %v60_v46, 920167782  ;;  %v77_v55 = vsel %vm67_vm4, %v63_v47, 1326507024  ;;  %v149_v3 = vshrl.u32 %v148_v48, 5 }
  0x98   :  { %v74_v57 = vsel %vm66_vm2, %v57_v45, %v73_v54  ;;  %v78_v58 = vsel %vm66_vm2, %v60_v46, %v77_v55  ;;  %v71_v60 = vsel %vm65_vm5, %v68_v49, %v70_v53  ;;  %v151_v4 = vsub.s32 32, %v150_v59 }
  0x99   :  { %v75_v61 = vsel %vm65_vm5, %v72_v51, %v74_v57  ;;  %v79_v62 = vsel %vm65_vm5, %v76_v52, %v78_v58  ;;  %v87_v8 = vmul.u32 %v537_v22, %v71_v60  ;;  %v153_v9 = vshll.u32 %v497_v24, %v150_v59 }
  0x9a   :  { %v550_v63 = vmul.u32.u64.low %v537_v22, %v79_v62  ;;  %v551_v0 = vmul.u32.u64.high %v537_v22, %v79_v62, %v550_v63  ;;  %v554_v1 = vmul.u32.u64.low %v537_v22, %v75_v61  ;;  %v555_v2 = vmul.u32.u64.high %v537_v22, %v75_v61, %v554_v1 }
  0x9b   :  { %v156_v11 = vshll.u32 %v498_v28, %v150_v59  ;;  %v159_v12 = vshll.u32 %v499_v30, %v150_v59  ;;  %v154_v13 = vshrl.u32 %v498_v28, %v151_v4  ;;  %v157_v14 = vshrl.u32 %v499_v30, %v151_v4 }
  0x9c   :  { %v160_v15 = vshrl.u32 %v500_v32, %v151_v4  ;;  %v162_v16 = vshll.u32 %v500_v32, %v150_v59  ;;  %vm89_vm6 = vc.u32 %v551_v0, %v554_v1  ;;  %v90_v18 = vadd.s32 1, %v555_v2 }
  0x9d   :  { %v163_v19 = vshrl.u32 %v501_v34, %v151_v4  ;;  %v165_v20 = vshll.u32 %v501_v34, %v150_v59  ;;  %v155_v21 = vor.u32 %v154_v13, %v153_v9  ;;  %v158_v23 = vor.u32 %v157_v14, %v156_v11 }
  0x9e   :  { %v161_v25 = vor.u32 %v160_v15, %v159_v12  ;;  %v166_v26 = vshrl.u32 %v502_v41, %v151_v4  ;;  %v91_v22 = vsel %vm89_vm6, %v90_v18, %v555_v2  ;;  %vm168_vm7 = vcmp.lt.s32.totalorder %v149_v3, 1 }
  0x9f   :  { %v164_v27 = vor.u32 %v163_v19, %v162_v16  ;;  %vm171_vm8 = vcmp.lt.s32.totalorder %v149_v3, 4  ;;  %v92_v28 = vadd.s32 %v91_v22, %v87_v8  ;;  %vm170_vm9 = vcmp.lt.s32.totalorder %v149_v3, 3 }
  0xa0   :  { %v167_v29 = vor.u32 %v166_v26, %v165_v20  ;;  %v173_v30 = vsel %vm171_vm8, %v161_v25, 2102212464  ;;  %v152_v31 = vshrl.u32 %v497_v24, %v151_v4  ;;  %v176_v32 = vsel %vm168_vm7, %v155_v21, %v158_v23 }
  0xa1   :  { %v177_v33 = vsel %vm171_vm8, %v164_v27, 920167782  ;;  %v180_v35 = vsel %vm168_vm7, %v158_v23, %v161_v25  ;;  %v93_v36 = vadd.s32 536870912, %v92_v28  ;;  %vm169_vm10 = vcmp.lt.s32.totalorder %v149_v3, 2 }
  0xa2   :  { %v178_v34 = vsel %vm170_vm9, %v161_v25, %v177_v33  ;;  %v181_v37 = vsel %vm171_vm8, %v167_v29, 1326507024  ;;  %v172_v38 = vsel %vm168_vm7, %v152_v31, %v155_v21  ;;  %v174_v39 = vsel %vm170_vm9, %v158_v23, %v173_v30 }
  0xa3   :  { %v179_v40 = vsel %vm169_vm10, %v176_v32, %v178_v34  ;;  %v182_v41 = vsel %vm170_vm9, %v164_v27, %v181_v37  ;;  %v94_v42 = vshrl.u32 %v93_v36, 30  ;;  %v175_v48 = vsel %vm169_vm10, %v172_v38, %v174_v39 }
  0xa4   :  { %v183_v43 = vsel %vm169_vm10, %v180_v35, %v182_v41  ;;  %v565_v44 = vmul.u32.u64.low %v184_v7, %v179_v40  ;;  %v566_v45 = vmul.u32.u64.high %v184_v7, %v179_v40, %v565_v44  ;;  %v191_v51 = vmul.u32 %v184_v7, %v175_v48 }
  0xa5   :  { %v568_v46 = vmul.u32.u64.low %v184_v7, %v183_v43  ;;  %v569_v47 = vmul.u32.u64.high %v184_v7, %v183_v43, %v568_v46  ;;  %v95_v24 = vshll.u32 %v94_v42, 30  ;;  %v88_v63 = vadd.s32 %v554_v1, %v551_v0 }
  0xa6   :  { %v194_v50 = vadd.s32 1, %v566_v45  ;;  %v118_v21 = vsub.s32 4, %v94_v42  ;;  %vm137_vm1 = vcmp.le.f32.partialorder %v136_v17, 0.7853982  ;;  %vm240_vm2 = vcmask 64512  }
  0xa7   :  { %v96_v49 = vsub.s32 %v92_v28, %v95_v24  ;;  %vm193_vm11 = vc.u32 %v569_v47, %v565_v44  ;;  %v192_v0 = vadd.s32 %v565_v44, %v569_v47  ;;  %vm124_vm9 = vweird.f32 %v527_v5 }
  0xa8   :  { %v195_v53 = vsel %vm193_vm11, %v194_v50, %v566_v45  ;;  %v119_v30 = vsel %vm34_vm14, %v118_v21, %v94_v42 }
  0xa9   :  { %v98_v52 = vsub.s32 0, %v96_v49  ;;  %v196_v54 = vadd.s32 %v195_v53, %v191_v51  ;;  %v121_v35 = vsel %vm33_vm15, 0, %v119_v30 }
  0xaa   :  { %v125_v38 = vadd.s32 3, %v121_v35  ;;  %v336_v41 = vand.u32 3, %v121_v35 }
  0xab   :  { %v457_v55 = vmin.u32 %v98_v52, %v96_v49  ;;  %v197_v56 = vadd.s32 536870912, %v196_v54 }
  0xac   :  { %v126_v44 = vand.u32 3, %v125_v38  ;;  %vm341_vm3 = vcmp.eq.s32.totalorder %v336_v41, 2  ;;  %vm338_vm6 = vcmp.eq.s32.totalorder %v336_v41, 0  ;;  %vm337_vm8 = vcmp.lt.s32.totalorder %v336_v41, 2 }
  0xad   :  { %v100_v57 = vclz %v457_v55  ;;  %v198_v58 = vshrl.u32 %v197_v56, 30 }
  0xae   :  { %vm131_vm4 = vcmp.eq.s32.totalorder %v126_v44, 2  ;;  %vm128_vm5 = vcmp.eq.s32.totalorder %v126_v44, 0  ;;  %vm127_vm7 = vcmp.lt.s32.totalorder %v126_v44, 2 }
  0xaf   :  { %v458_v59 = vadd.s32 4294967294, %v100_v57  ;;  %v199_v60 = vshll.u32 %v198_v58, 30  ;;  %v222_v40 = vsub.s32 4, %v198_v58 }
  0xb1   :  { %vm459_vm12 = vcmp.lt.s32.totalorder %v458_v59, 0  ;;  %v200_v62 = vsub.s32 %v196_v54, %v199_v60  ;;  %v223_v42 = vsel %vm138_vm0, %v222_v40, %v198_v58 }
  0xb2   :  { %v103_v61 = vsel %vm459_vm12, 0, %v458_v59 }
  0xb3   :  { %v104_v2 = vsub.s32 32, %v103_v61  ;;  %v108_v3 = vsub.s32 4294967266, %v103_v61  ;;  %v202_v4 = vsub.s32 0, %v200_v62  ;;  %v105_v7 = vshll.u32 %v96_v49, %v103_v61 }
  0xb4   :  { %v225_v49 = vsel %vm137_vm1, 0, %v223_v42 }
  0xb5   :  { %v106_v8 = vshrl.u32 %v88_v63, %v104_v2  ;;  %v109_v9 = vadd.s32 127, %v108_v3  ;;  %v461_v11 = vmin.u32 %v202_v4, %v200_v62  ;;  %v229_v55 = vadd.s32 3, %v225_v49 }
  0xb6   :  { %v439_v59 = vand.u32 3, %v225_v49 }
  0xb7   :  { %v107_v12 = vor.u32 %v106_v8, %v105_v7  ;;  %v110_v13 = vshll.u32 %v109_v9, 23  ;;  %v204_v14 = vclz %v461_v11  ;;  %v230_v58 = vand.u32 3, %v229_v55 }
  0xb8   :  { %vm444_vm11 = vcmp.eq.s32.totalorder %v439_v59, 2 }
  0xb9   :  { %v111_v15 = vor.u32 4788187, %v110_v13  ;;  %v462_v16 = vadd.s32 4294967294, %v204_v14  ;;  %v114_v19 = vcvt.s32.f32 %v107_v12  ;;  %vm235_vm10 = vcmp.eq.s32.totalorder %v230_v58, 2 }
  0xba   :  { %vm232_vm12 = vcmp.eq.s32.totalorder %v230_v58, 0 }
  0xbb   :  { %v112_v18 = vand.u32 2147483647, %v111_v15  ;;  %vm463_vm13 = vcmp.lt.s32.totalorder %v462_v16, 0 }
  0xbc   :  { %v207_v23 = vsel %vm463_vm13, 0, %v462_v16  ;;  %vm441_vm13 = vcmp.eq.s32.totalorder %v439_v59, 0 }
  0xbd   :  { %v115_v20 = vmul.f32 %v114_v19, %v112_v18  ;;  %v208_v1 = vsub.s32 32, %v207_v23  ;;  %v212_v25 = vsub.s32 4294967266, %v207_v23  ;;  %v209_v22 = vshll.u32 %v200_v62, %v207_v23 }
  0xbf   :  { %v116_v26 = vxor.u32 2147483648, %v115_v20  ;;  %v210_v27 = vshrl.u32 %v192_v0, %v208_v1  ;;  %v213_v28 = vadd.s32 127, %v212_v25 }
  0xc1   :  { %v117_v29 = vsel %vm34_vm14, %v116_v26, %v115_v20  ;;  %v211_v32 = vor.u32 %v210_v27, %v209_v22  ;;  %v214_v33 = vshll.u32 %v213_v28, 23  ;;  %vm231_vm14 = vcmp.lt.s32.totalorder %v230_v58, 2 }
  0xc2   :  { %v120_v31 = vsel %vm33_vm15, %v527_v5, %v117_v29  ;;  %vm440_vm15 = vcmp.lt.s32.totalorder %v439_v59, 2 }
  0xc3   :  { %488 = vcosq.f32 %v120_v31  ;;  %v215_v36 = vor.u32 4788187, %v214_v33  ;;  %v218_v37 = vcvt.s32.f32 %v211_v32 }
  0xc4   :  { %490 = vsinq.f32 %v120_v31 }
  0xc5   :  { %v216_v34 = vand.u32 2147483647, %v215_v36 }
  0xc7   :  { %v219_v39 = vmul.f32 %v218_v37, %v216_v34 }
  0xc9   :  { %v220_v43 = vxor.u32 2147483648, %v219_v39 }
  0xcb   :  { %v221_v6 = vsel %vm138_vm0, %v220_v43, %v219_v39  ;;  %vm228_vm0 = vweird.f32 %v531_v10 }
  0xcc   :  { %v224_v46 = vsel %vm137_vm1, %v531_v10, %v221_v6 }
  0xcd   :  { %v489_v45 = vpop.eup %488  ;;  %492 = vcosq.f32 %v224_v46 }
  0xce   :  { %v491_v47 = vpop.eup %490  ;;  %v132_v24 = vxor.u32 2147483648, %v489_v45  ;;  %494 = vsinq.f32 %v224_v46 }
  0xcf   :  { %v129_v48 = vxor.u32 2147483648, %v491_v47 }
  0xd0   :  { %v133_v50 = vsel %vm131_vm4, %v132_v24, %v491_v47  ;;  %v343_v51 = vsel %vm341_vm3, %v132_v24, %v491_v47 }
  0xd1   :  { %v130_v17 = vsel %vm128_vm5, %v489_v45, %v129_v48  ;;  %v340_v52 = vsel %vm338_vm6, %v489_v45, %v129_v48 }
  0xd2   :  { %v134_v53 = vsel %vm127_vm7, %v130_v17, %v133_v50  ;;  %v344_v54 = vsel %vm337_vm8, %v340_v52, %v343_v51 }
  0xd3   :  { %v135_v56 = vsel %vm124_vm9, nan, %v134_v53  ;;  %v345_v57 = vsel %vm124_vm9, nan, %v344_v54 }
  0xd4   :  { %241 = vst.msk [vmem:[%s605_s2] sm:$0xff] %vm240_vm2, %v135_v56  ;;  %449 = vst.msk [vmem:[%s605_s2 + $0x10] sm:$0xff] %vm240_vm2, %v345_v57 }
  0xd7   :  { %v493_v60 = vpop.eup %492 }
  0xd8   :  { %v495_v61 = vpop.eup %494  ;;  %v236_v5 = vxor.u32 2147483648, %v493_v60 }
  0xd9   :  { %v233_v62 = vxor.u32 2147483648, %v495_v61 }
  0xda   :  { %v237_v63 = vsel %vm235_vm10, %v236_v5, %v495_v61  ;;  %v446_v2 = vsel %vm444_vm11, %v236_v5, %v495_v61 }
  0xdb   :  { %v234_v3 = vsel %vm232_vm12, %v493_v60, %v233_v62  ;;  %v443_v4 = vsel %vm441_vm13, %v493_v60, %v233_v62 }
  0xdc   :  { %v238_v7 = vsel %vm231_vm14, %v234_v3, %v237_v63  ;;  %v447_v8 = vsel %vm440_vm15, %v443_v4, %v446_v2 }
  0xdd   :  { %v239_v9 = vsel %vm228_vm0, nan, %v238_v7  ;;  %v448_v11 = vsel %vm228_vm0, nan, %v447_v8 }
  0xde   :  { %242 = vst.msk [vmem:[%s605_s2 + $0x8] sm:$0xff] %vm240_vm2, %v239_v9  ;;  %450 = vst.msk [vmem:[%s605_s2 + $0x18] sm:$0xff] %vm240_vm2, %v448_v11 }

</bundles_post_ra>
